<compile_context>
chip_gen: v7x
topology: tpu7x:2x2x1
jax: 0.10.0
libtpu: 0.0.40
codegen_flags: <defaults>
</compile_context>

<pallas_src>
import jax
import jax.numpy as jnp
from jax import lax
from jax.experimental import pallas as pl
from jax.experimental.pallas import tpu as pltpu


def _round_up(x, m):
    return ((int(x) + m - 1) // m) * m


def _cdiv(a, b):
    return -(-int(a) // int(b))


def _vmem_cap_bytes():
    """Physical VMEM per TensorCore; 64 MiB fallback is safe on every gen."""
    try:
        cap = int(pltpu.get_tpu_info().vmem_capacity_bytes)
        if cap > 0:
            return cap
    except Exception:
        pass
    return 64 * 1024 * 1024


def _vmem_budget_bytes():
    """Working-set budget (leave headroom for Mosaic internal scratch)."""
    cap = _vmem_cap_bytes()
    budget = max(16 << 20, min(int(cap * 0.85), cap - (8 << 20)))
    return budget, cap


def _puresvd_fused_kernel(w_ref, utab_ref, itab_ref, uidx_ref, iidx_ref, o_ref):
    # w_ref:    [Dp, Dp]   f32 svd weight (VMEM-resident across the grid)
    # utab_ref: [Dp, NUp]  user embedding table, D-major, VMEM-resident
    # itab_ref: [Dp, NIp]  item embedding table, D-major, VMEM-resident
    # uidx_ref: [1, TB]    int32 user indices for this batch tile
    # iidx_ref: [1, TB]    int32 item indices for this batch tile
    # o_ref:    [1, TB]    f32 lane-dense output tile
    uidx = uidx_ref[...]
    iidx = iidx_ref[...]
    tb = uidx.shape[1]
    nu = utab_ref.shape[1]
    ni = itab_ref.shape[1]
    tdt = utab_ref.dtype

    # In-kernel row gather via one-hot matmul (guaranteed to lower; exact,
    # since one-hot entries are 0/1).  Appropriate for VMEM-resident tables
    # up to a couple of thousand rows.
    # TODO(synk): for large tables, switch to a dynamic-gather (jnp.take on
    # the VMEM-resident table) or a manual DMA row gather from HBM; the
    # one-hot VPU/MXU cost grows linearly with the table height.
    u_oh = (lax.broadcasted_iota(jnp.int32, (nu, tb), 0) == uidx).astype(tdt)
    i_oh = (lax.broadcasted_iota(jnp.int32, (ni, tb), 0) == iidx).astype(tdt)
    ut = jnp.dot(utab_ref[...], u_oh, preferred_element_type=jnp.float32)  # [Dp, TB]
    it = jnp.dot(itab_ref[...], i_oh, preferred_element_type=jnp.float32)  # [Dp, TB]

    # s[d, b] = sum_e W[d, e] * item[b, e]  (f32 weight, f32 accumulate)
    s = jnp.dot(w_ref[...], it, preferred_element_type=jnp.float32)        # [Dp, TB]
    # out[b] = sum_d user[b, d] * s[d, b]   (VPU mul + sublane reduce)
    o_ref[...] = jnp.sum(ut * s, axis=0, keepdims=True).astype(o_ref.dtype)


def _puresvd_gathered_kernel(w_ref, ut_ref, it_ref, o_ref):
    # Fallback path: rows gathered by XLA outside the kernel, D-major tiles.
    ut = ut_ref[...].astype(jnp.float32)
    it = it_ref[...].astype(jnp.float32)
    s = jnp.dot(w_ref[...], it, preferred_element_type=jnp.float32)        # [Dp, TB]
    o_ref[...] = jnp.sum(ut * s, axis=0, keepdims=True).astype(o_ref.dtype)


def puresvd_forward(user_embedding, item_embedding, svd_weight,
                    user_idx, item_idx, *, tb=None, compute_dtype=None,
                    fuse_gather=None):
    """Equivalent of PureSVD.forward(user, item) -> [B] float32.

    tb:            optional batch-tile override (rounded to a multiple of 128);
                   by default the tile is sized from the per-generation VMEM
                   budget.
    compute_dtype: optional transfer dtype for the embedding tables only
                   (e.g. jnp.bfloat16 on v6e/v7x).  The svd weight and all
                   accumulation stay f32.  Opt-in (quantizes the embeddings).
    fuse_gather:   force the fused (in-kernel gather) or fallback path;
                   default: fused iff the tables are small.
    """
    NU, D = (int(s) for s in user_embedding.shape)
    NI = int(item_embedding.shape[0])
    B = int(user_idx.shape[0])

    e_dt = (jnp.dtype(compute_dtype) if compute_dtype is not None
            else jnp.dtype(user_embedding.dtype))
    e_isz = e_dt.itemsize
    # Pad the latent dim to the sublane granule (8 f32 / 16 bf16) so the
    # matmuls and the axis-0 reduce see no masked sublanes.
    d_gran = 8 if e_isz >= 4 else 16
    Dp = _round_up(max(D, 1), d_gran)

    if fuse_gather is None:
        # One-hot in-kernel gather only pays off while the tables are small.
        fuse_gather = (NU + NI) <= 2048

    budget, cap = _vmem_budget_bytes()
    margin = 4 << 20

    nu_p = _round_up(NU, 8)
    ni_p = _round_up(NI, 8)
    w_lane = _round_up(Dp, 128)

    # Conservative VMEM accounting (resident blocks double-buffered).
    # TODO(synk): single-buffer the constant-index resident blocks via
    # pipeline_mode=pl.Buffered(1) to halve their footprint once validated.
    if fuse_gather:
        fixed = 2 * Dp * w_lane * 4                               # weight
        fixed += 2 * Dp * _round_up(nu_p, 128) * e_isz            # user table
        fixed += 2 * Dp * _round_up(ni_p, 128) * e_isz            # item table
        per_tb = ((nu_p + ni_p) * (e_isz + 4)   # one-hots + iota/cmp temps
                  + 3 * Dp * 4                  # gathered ut/it + s (f32)
                  + 2 * 2 * 8 * 4               # idx tiles (x2 bufs, 8-subl pad)
                  + 2 * 8 * 4)                  # output tile
    else:
        fixed = 2 * Dp * w_lane * 4
        per_tb = (2 * 2 * Dp * e_isz            # ut/it tiles (x2 buffers)
                  + 2 * Dp * 4                  # f32 upcast / s intermediate
                  + 2 * 8 * 4)                  # output tile

    # --- batch-tile selection (budget-driven, >=2 steps for v7x megacore) ---
    tb_cap = max(128, _round_up(int(tb), 128)) if tb is not None else 32768
    tb_budget = max(128, ((budget - fixed - margin) // max(per_tb, 1))
                    // 128 * 128)
    tb_max = max(128, min(tb_cap, tb_budget))

    B_pad0 = max(_round_up(B, 128), 128)       # lane-dense output even at tiny B
    min_steps = 2 if B_pad0 >= 256 else 1      # >=2 steps -> both TCs on v7x
    steps = max(min_steps, _cdiv(B_pad0, tb_max))
    TB = min(tb_max, _round_up(_cdiv(B_pad0, steps), 128))
    B_pad = _round_up(B_pad0, TB)
    grid = (B_pad // TB,)

    need = fixed + per_tb * TB
    # Never set the scoped limit below the actual need (shrinking TB above is
    # what keeps `need` inside the per-generation budget).
    vmem_limit = int(min(max(need + margin, 32 << 20), cap - (2 << 20)))

    compiler_params = pltpu.CompilerParams(
        dimension_semantics=("parallel",),
        vmem_limit_bytes=vmem_limit,
    )

    # --- operands ------------------------------------------------------------
    pad_b = B_pad - B
    uidx = jnp.concatenate(
        [user_idx.astype(jnp.int32), jnp.zeros((pad_b,), jnp.int32)])
    iidx = jnp.concatenate(
        [item_idx.astype(jnp.int32), jnp.zeros((pad_b,), jnp.int32)])

    w = svd_weight.astype(jnp.float32)
    w = jnp.pad(w, ((0, Dp - D), (0, Dp - D)))

    if fuse_gather:
        u_tab = user_embedding
        i_tab = item_embedding
        if compute_dtype is not None:
            u_tab = u_tab.astype(e_dt)
            i_tab = i_tab.astype(e_dt)
        # Tiny wrapper-side pad+transpose of the *tables* (not the batch).
        u_tab = jnp.pad(u_tab, ((0, nu_p - NU), (0, Dp - D))).T   # [Dp, NUp]
        i_tab = jnp.pad(i_tab, ((0, ni_p - NI), (0, Dp - D))).T   # [Dp, NIp]
        uidx2 = uidx.reshape(1, B_pad)
        iidx2 = iidx.reshape(1, B_pad)

        cost = pl.CostEstimate(
            flops=int(2 * B_pad * Dp * (nu_p + ni_p + Dp) + 2 * B_pad * Dp),
            transcendentals=0,
            bytes_accessed=int(Dp * (nu_p + ni_p) * e_isz + Dp * Dp * 4
                               + 2 * B_pad * 4 + B_pad * 4),
        )

        out = pl.pallas_call(
            _puresvd_fused_kernel,
            out_shape=jax.ShapeDtypeStruct((1, B_pad), jnp.float32),
            grid_spec=pltpu.PrefetchScalarGridSpec(
                num_scalar_prefetch=0,
                grid=grid,
                in_specs=[
                    # Constant block index -> fetched once, VMEM-resident.
                    pl.BlockSpec((Dp, Dp), lambda i: (0, 0)),
                    pl.BlockSpec((Dp, nu_p), lambda i: (0, 0)),
                    pl.BlockSpec((Dp, ni_p), lambda i: (0, 0)),
                    # Per-tile index slabs, pipelined over the batch grid.
                    pl.BlockSpec((1, TB), lambda i: (0, i)),
                    pl.BlockSpec((1, TB), lambda i: (0, i)),
                ],
                out_specs=pl.BlockSpec((1, TB), lambda i: (0, i)),
            ),
            compiler_params=compiler_params,
            cost_estimate=cost,
        )(w, u_tab, i_tab, uidx2, iidx2)
    else:
        # Fallback for large tables: XLA gathers the rows; kernel consumes
        # D-major embedding tiles (lane-dense output, resident weight).
        u_g = user_embedding[uidx]             # [B_pad, D]
        i_g = item_embedding[iidx]
        if compute_dtype is not None:
            u_g = u_g.astype(e_dt)
            i_g = i_g.astype(e_dt)
        u_t = jnp.pad(u_g, ((0, 0), (0, Dp - D))).T                # [Dp, B_pad]
        i_t = jnp.pad(i_g, ((0, 0), (0, Dp - D))).T

        cost = pl.CostEstimate(
            flops=int(2 * B_pad * Dp * Dp + 2 * B_pad * Dp),
            transcendentals=0,
            bytes_accessed=int(2 * B_pad * Dp * e_isz + Dp * Dp * 4
                               + B_pad * 4),
        )

        out = pl.pallas_call(
            _puresvd_gathered_kernel,
            out_shape=jax.ShapeDtypeStruct((1, B_pad), jnp.float32),
            grid_spec=pltpu.PrefetchScalarGridSpec(
                num_scalar_prefetch=0,
                grid=grid,
                in_specs=[
                    pl.BlockSpec((Dp, Dp), lambda i: (0, 0)),
                    pl.BlockSpec((Dp, TB), lambda i: (0, i)),
                    pl.BlockSpec((Dp, TB), lambda i: (0, i)),
                ],
                out_specs=pl.BlockSpec((1, TB), lambda i: (0, i)),
            ),
            compiler_params=compiler_params,
            cost_estimate=cost,
        )(w, u_t, i_t)

    return out[0, :B]


def _reference(user_embedding, item_embedding, svd_weight, user_idx, item_idx):
    u = user_embedding[user_idx]
    it = item_embedding[item_idx]
    return jnp.sum((u @ svd_weight) * it, axis=1)


if __name__ == "__main__":
    key = jax.random.PRNGKey(0)
    k_ue, k_ie, k_w, k_u, k_i, k_u2, k_i2 = jax.random.split(key, 7)

    num_users, num_items, latent_dim, batch = 32, 48, 10, 8

    user_embedding = jax.random.normal(k_ue, (num_users, latent_dim), jnp.float32)
    item_embedding = jax.random.normal(k_ie, (num_items, latent_dim), jnp.float32)
    svd_weight = jax.random.normal(k_w, (latent_dim, latent_dim), jnp.float32)

    user_idx = jax.random.randint(k_u, (batch,), 0, num_users, jnp.int32)
    item_idx = jax.random.randint(k_i, (batch,), 0, num_items, jnp.int32)

    ref = _reference(user_embedding, item_embedding, svd_weight,
                     user_idx, item_idx)

    # 1) Fused in-kernel gather, f32 (single lane-dense 128-wide tile).
    out = puresvd_forward(user_embedding, item_embedding, svd_weight,
                          user_idx, item_idx)
    out = jax.block_until_ready(out)
    assert out.shape == (batch,)
    assert jnp.allclose(out, ref, atol=2e-3, rtol=2e-3), (out, ref)

    # 2) bf16 embedding transfer (svd weight + accumulation stay f32).
    out_bf16 = puresvd_forward(user_embedding, item_embedding, svd_weight,
                               user_idx, item_idx, compute_dtype=jnp.bfloat16)
    out_bf16 = jax.block_until_ready(out_bf16)
    assert jnp.allclose(out_bf16, ref, atol=0.3, rtol=5e-2), (out_bf16, ref)

    # 3) Larger batch -> multi-step grid (>= 2 steps; both TCs on v7x).
    batch2 = 300
    user_idx2 = jax.random.randint(k_u2, (batch2,), 0, num_users, jnp.int32)
    item_idx2 = jax.random.randint(k_i2, (batch2,), 0, num_items, jnp.int32)
    ref2 = _reference(user_embedding, item_embedding, svd_weight,
                      user_idx2, item_idx2)
    out2 = puresvd_forward(user_embedding, item_embedding, svd_weight,
                           user_idx2, item_idx2)
    out2 = jax.block_until_ready(out2)
    assert out2.shape == (batch2,)
    assert jnp.allclose(out2, ref2, atol=2e-3, rtol=2e-3), (out2, ref2)

    # 4) Forced large-table fallback path (XLA-side gather, D-major tiles).
    out3 = puresvd_forward(user_embedding, item_embedding, svd_weight,
                           user_idx2, item_idx2, fuse_gather=False, tb=128)
    out3 = jax.block_until_ready(out3)
    assert jnp.allclose(out3, ref2, atol=2e-3, rtol=2e-3), (out3, ref2)

    print("KERNEL_OK")
</pallas_src>

<mosaic_0001>
module attributes {stable_mosaic.version = 11 : i64} {
  func.func @_puresvd_fused_kernel(%arg0: i32, %arg1: memref<16x16xf32, #tpu.memory_space<vmem>>, %arg2: memref<16x32xf32, #tpu.memory_space<vmem>>, %arg3: memref<16x48xf32, #tpu.memory_space<vmem>>, %arg4: memref<1x128xi32, #tpu.memory_space<vmem>>, %arg5: memref<1x128xi32, #tpu.memory_space<vmem>>, %arg6: memref<1x128xf32, #tpu.memory_space<vmem>>) attributes {dimension_semantics = [#tpu.dimension_semantics<parallel>], iteration_bounds = array<i64: 1>, scalar_prefetch = 0 : i64, scratch_operands = 0 : i64, tpu.core_type = #tpu.core_type<tc>, window_params = [{pipeline_mode = #tpu.pipeline_mode<synchronous>, transform_indices = @transform_0, window_bounds = array<i64: 16, 16>}, {pipeline_mode = #tpu.pipeline_mode<synchronous>, transform_indices = @transform_1, window_bounds = array<i64: 16, 32>}, {pipeline_mode = #tpu.pipeline_mode<synchronous>, transform_indices = @transform_2, window_bounds = array<i64: 16, 48>}, {transform_indices = @transform_3, window_bounds = array<i64: 1, 128>}, {transform_indices = @transform_4, window_bounds = array<i64: 1, 128>}, {transform_indices = @transform_5, window_bounds = array<i64: 1, 128>}]} {
    %c0 = arith.constant 0 : index
    %c0_0 = arith.constant 0 : index
    %0 = vector.load %arg4[%c0, %c0_0] : memref<1x128xi32, #tpu.memory_space<vmem>>, vector<1x128xi32>
    %c0_1 = arith.constant 0 : index
    %c0_2 = arith.constant 0 : index
    %1 = vector.load %arg5[%c0_1, %c0_2] : memref<1x128xi32, #tpu.memory_space<vmem>>, vector<1x128xi32>
    %2 = tpu.iota {dimensions = array<i32: 0>} : vector<32x128xi32>
    %3 = vector.broadcast %0 : vector<1x128xi32> to vector<32x128xi32>
    %4 = arith.cmpi eq, %2, %3 : vector<32x128xi32>
    %5 = arith.extui %4 : vector<32x128xi1> to vector<32x128xi32>
    %6 = arith.sitofp %5 : vector<32x128xi32> to vector<32x128xf32>
    %7 = tpu.iota {dimensions = array<i32: 0>} : vector<48x128xi32>
    %8 = vector.broadcast %1 : vector<1x128xi32> to vector<48x128xi32>
    %9 = arith.cmpi eq, %7, %8 : vector<48x128xi32>
    %10 = arith.extui %9 : vector<48x128xi1> to vector<48x128xi32>
    %11 = arith.sitofp %10 : vector<48x128xi32> to vector<48x128xf32>
    %c0_3 = arith.constant 0 : index
    %c0_4 = arith.constant 0 : index
    %12 = vector.load %arg2[%c0_3, %c0_4] : memref<16x32xf32, #tpu.memory_space<vmem>>, vector<16x32xf32>
    %cst = arith.constant dense<0.000000e+00> : vector<16x128xf32>
    %13 = tpu.matmul %12, %6, %cst {dimension_numbers = #tpu.dot_dimension_numbers<[1], [0], [0], [1], [0, 0, 1, 1], [], []>} : vector<16x32xf32>, vector<32x128xf32>, vector<16x128xf32> -> vector<16x128xf32>
    %c0_5 = arith.constant 0 : index
    %c0_6 = arith.constant 0 : index
    %14 = vector.load %arg3[%c0_5, %c0_6] : memref<16x48xf32, #tpu.memory_space<vmem>>, vector<16x48xf32>
    %cst_7 = arith.constant dense<0.000000e+00> : vector<16x128xf32>
    %15 = tpu.matmul %14, %11, %cst_7 {dimension_numbers = #tpu.dot_dimension_numbers<[1], [0], [0], [1], [0, 0, 1, 1], [], []>} : vector<16x48xf32>, vector<48x128xf32>, vector<16x128xf32> -> vector<16x128xf32>
    %c0_8 = arith.constant 0 : index
    %c0_9 = arith.constant 0 : index
    %16 = vector.load %arg1[%c0_8, %c0_9] : memref<16x16xf32, #tpu.memory_space<vmem>>, vector<16x16xf32>
    %cst_10 = arith.constant dense<0.000000e+00> : vector<16x128xf32>
    %17 = tpu.matmul %16, %15, %cst_10 {dimension_numbers = #tpu.dot_dimension_numbers<[1], [0], [0], [1], [0, 0, 1, 1], [], []>} : vector<16x16xf32>, vector<16x128xf32>, vector<16x128xf32> -> vector<16x128xf32>
    %18 = arith.mulf %13, %17 : vector<16x128xf32>
    %cst_11 = arith.constant dense<0.000000e+00> : vector<128xf32>
    %19 = vector.multi_reduction <add>, %18, %cst_11 [0] : vector<16x128xf32> to vector<128xf32>
    %20 = vector.shape_cast %19 : vector<128xf32> to vector<1x128xf32>
    %c0_12 = arith.constant 0 : index
    %c0_13 = arith.constant 0 : index
    %21 = vector.load %arg6[%c0_12, %c0_13] : memref<1x128xf32, #tpu.memory_space<vmem>>, vector<1x128xf32>
    tpu.vector_store %arg6[%c0_12, %c0_13], %20 {strides = array<i32>} : memref<1x128xf32, #tpu.memory_space<vmem>>, vector<1x128xf32>,
    return
  }
  func.func @transform_0(%arg0: i32) -> (i32, i32) {
    %c0_i32 = arith.constant 0 : i32
    %c0_i32_0 = arith.constant 0 : i32
    %c0_i32_1 = arith.constant 0 : i32
    return %c0_i32, %c0_i32_0 : i32, i32
  }
  func.func @transform_1(%arg0: i32) -> (i32, i32) {
    %c0_i32 = arith.constant 0 : i32
    %c0_i32_0 = arith.constant 0 : i32
    %c0_i32_1 = arith.constant 0 : i32
    return %c0_i32, %c0_i32_0 : i32, i32
  }
  func.func @transform_2(%arg0: i32) -> (i32, i32) {
    %c0_i32 = arith.constant 0 : i32
    %c0_i32_0 = arith.constant 0 : i32
    %c0_i32_1 = arith.constant 0 : i32
    return %c0_i32, %c0_i32_0 : i32, i32
  }
  func.func @transform_3(%arg0: i32) -> (i32, i32) {
    %c0_i32 = arith.constant 0 : i32
    %c0_i32_0 = arith.constant 0 : i32
    return %c0_i32, %arg0 : i32, i32
  }
  func.func @transform_4(%arg0: i32) -> (i32, i32) {
    %c0_i32 = arith.constant 0 : i32
    %c0_i32_0 = arith.constant 0 : i32
    return %c0_i32, %arg0 : i32, i32
  }
  func.func @transform_5(%arg0: i32) -> (i32, i32) {
    %c0_i32 = arith.constant 0 : i32
    %c0_i32_0 = arith.constant 0 : i32
    return %c0_i32, %arg0 : i32, i32
  }
}

</mosaic_0001>

<bundles_post_ra>
// kernel: tpu_custom_call.1
= control target key start
LH: loop header
LB: loop body
LE: loop exit
PB: predicated region body
PF: predicated region fallthrough
CT: control target
= control target key end

     0   :  { %10 = vsyncpa [#allocation3], 0  ;;  %s700_s0 = inlined_call_operand.hbm [shape: f32[16,16], index: 0, kind: input, shape index: {}]   ;;  %s701_s1 = inlined_call_operand.hbm [shape: f32[16,32], index: 1, kind: input, shape index: {}]   ;;  %s702_s2 = inlined_call_operand.hbm [shape: f32[16,48], index: 2, kind: input, shape index: {}]   ;;  %s703_s3 = inlined_call_operand.vmem [shape: s32[1,128], index: 3, kind: input, shape index: {}]   ;;  %s704_s4 = inlined_call_operand.vmem [shape: s32[1,128], index: 4, kind: input, shape index: {}]   ;;  %s705_s5 = inlined_call_operand.hbm [shape: f32[1,128], index: 5, kind: output, shape index: {}]  }
   0x1   :  { %11 = vsyncpa [#allocation6], 0 }
   0x2   :  { %12 = vsyncpa [#allocation4], 0  ;;  %s591_s18 = smov [#allocation5]   ;;  %s592_s20 = smov [#allocation2]  }
   0x3   :  { %s30_s19 = sshll.u32 %s591_s18, 4  ;;  %s18_s21 = sshll.u32 %s592_s20, 4  ;;  %s31_s19 = int_to_ptr.vmem [resolvable:$true] %s30_s19  ;;  %s628_s21 = int_to_ptr.vmem [resolvable:$true] %s18_s21 }
   0x4   :  { %s497_s24 = scalar_lea.hbm %s701_s1, 256 }
   0x5   :  { %p498_p0 = scmp.ne.s32.totalorder %s701_s1, %s497_s24  ;;  %p501_p1 = scmp.lt.u32.totalorder %s497_s24, %s701_s1 }
   0x7   :  { %p503_p2 = pnand %p501_p1, %p498_p0 }
   0x9   :  { %506 = shalt.err (!%p503_p2)
}
   0xa   :  { %s507_s29 = scalar_lea.vmem %s31_s19, 256  ;;  %p512_p4 = scmp.lt.s32.totalorder %s31_s19, %s31_s19 }
   0xb   :  { %p508_p3 = scmp.ne.s32.totalorder %s31_s19, %s507_s29  ;;  %p513_p5 = scmp.lt.s32.totalorder %s507_s29, %s507_s29 }
   0xd   :  { %p514_p6 = por %p513_p5, %p512_p4 }
   0xf   :  { %p515_p7 = pnand %p514_p6, %p508_p3 }
  0x11   :  { %518 = shalt.err (!%p515_p7)
}
  0x12   :  { %s593_s30 = smov 128   ;;  %s594_s6 = smov 8  }
  0x13   :  { %36 = dma.hbm_to_vmem [thread:$0]  %s701_s1, 256, %s31_s19, [#allocation6], %s593_s30, %s593_s30, %s594_s6  }
  0x14   :  { %s519_s11 = scalar_lea.hbm %s700_s0, 256 }
  0x15   :  { %p520_p8 = scmp.ne.s32.totalorder %s700_s0, %s519_s11  ;;  %p523_p9 = scmp.lt.u32.totalorder %s519_s11, %s700_s0 }
  0x17   :  { %p525_p10 = pnand %p523_p9, %p520_p8 }
  0x19   :  { %528 = shalt.err (!%p525_p10)
}
  0x1a   :  { %s529_s16 = scalar_lea.vmem %s628_s21, 256  ;;  %p534_p12 = scmp.lt.s32.totalorder %s628_s21, %s628_s21 }
  0x1b   :  { %p530_p11 = scmp.ne.s32.totalorder %s628_s21, %s529_s16  ;;  %p535_p13 = scmp.lt.s32.totalorder %s529_s16, %s529_s16 }
  0x1d   :  { %p536_p0 = por %p535_p13, %p534_p12 }
  0x1f   :  { %p537_p1 = pnand %p536_p0, %p530_p11 }
  0x21   :  { %540 = shalt.err (!%p537_p1)
}
  0x22   :  { %24 = dma.hbm_to_vmem [thread:$0]  %s700_s0, 256, %s628_s21, [#allocation3], %s593_s30, %s593_s30, %s594_s6  }
  0x23   :  { %s595_s18 = smov [#allocation7]   ;;  %s541_s23 = scalar_lea.hbm %s702_s2, 256 }
  0x24   :  { %s42_s19 = sshll.u32 %s595_s18, 4  ;;  %p542_p2 = scmp.ne.s32.totalorder %s702_s2, %s541_s23  ;;  %s43_s19 = int_to_ptr.vmem [resolvable:$true] %s42_s19 }
  0x25   :  { %p545_p3 = scmp.lt.u32.totalorder %s541_s23, %s702_s2 }
  0x27   :  { %p547_p4 = pnand %p545_p3, %p542_p2 }
  0x29   :  { %550 = shalt.err (!%p547_p4)
}
  0x2a   :  { %s551_s28 = scalar_lea.vmem %s43_s19, 256  ;;  %p556_p6 = scmp.lt.s32.totalorder %s43_s19, %s43_s19 }
  0x2b   :  { %p552_p5 = scmp.ne.s32.totalorder %s43_s19, %s551_s28  ;;  %p557_p7 = scmp.lt.s32.totalorder %s551_s28, %s551_s28 }
  0x2d   :  { %p558_p8 = por %p557_p7, %p556_p6 }
  0x2f   :  { %p559_p9 = pnand %p558_p8, %p552_p5 }
  0x31   :  { %562 = shalt.err (!%p559_p9)
}
  0x32   :  { %48 = dma.hbm_to_vmem [thread:$0]  %s702_s2, 256, %s43_s19, [#allocation6], %s593_s30, %s593_s30, %s594_s6  }
  0x33   :  { %585 = dma.done.wait [#allocation3], 256  }
  0x34   :  { %586 = vsyncadd [#allocation3], 4294967040 }
  0x35   :  { %587 = dma.done.wait [#allocation6], 512  }
  0x36   :  { %588 = vsyncadd [#allocation6], 4294966784  ;;  %v64_v0 = vlaneseq  ;;  %vm195_vm0 = vcmask 392192   ;;  %v392_v7 = vld [vmem:[%s704_s4] ss:$0 sm:$0xff]  ;;  %v194_v11 = vld [vmem:[#allocation7 + $0x8] sm:$0xff] }
  0x37   :  { %v193_v8 = vld [vmem:[#allocation7] sm:$0xff]  ;;  %v596_v10 = vmov 1.0|1.0   ;;  %v109_v12 = vld [vmem:[#allocation5] sm:$0xff]  ;;  %v110_v13 = vld [vmem:[#allocation5 + $0x8] sm:$0xff] }
  0x38   :  { %v65_v1 = vshrl.u32 %v64_v0, 7  ;;  %456 = vmatprep.mubr.msk.f32.mxu1 %vm195_vm0, %v193_v8  ;;  %v387_v9 = vld [vmem:[%s703_s3] ss:$0 sm:$0xff]  ;;  %v278_v18 = vld [vmem:[#allocation2 + $0x8] sm:$0xff]  ;;  %s597_s3 = smov [#allocation8]  }
  0x39   :  { %v277_v14 = vld [vmem:[#allocation2] sm:$0xff]  ;;  %s377_s4 = sshll.u32 %s597_s3, 4  ;;  %s378_s4 = int_to_ptr.vmem [resolvable:$true] %s377_s4 }
  0x3a   :  { %v66_v2 = vadd.s32 8, %v65_v1  ;;  %v67_v3 = vadd.s32 16, %v65_v1  ;;  %v68_v4 = vadd.s32 24, %v65_v1  ;;  %v85_v5 = vadd.s32 32, %v65_v1  ;;  %s563_s6 = scalar_lea.vmem %s378_s4, 16  ;;  %s567_s8 = scalar_lea.vmem %s378_s4, 32 }
  0x3b   :  { %v86_v6 = vadd.s32 40, %v65_v1  ;;  %vm91_vm1 = vcmp.eq.s32.totalorder %v65_v1, %v392_v7  ;;  %vm73_vm8 = vcmp.eq.s32.totalorder %v65_v1, %v387_v9  ;;  %p564_p10 = scmp.ne.s32.totalorder %s378_s4, %s563_s6  ;;  %p568_p11 = scmp.lt.s32.totalorder %s378_s4, %s378_s4 }
  0x3c   :  { %vm92_vm2 = vcmp.eq.s32.totalorder %v66_v2, %v392_v7  ;;  %vm93_vm3 = vcmp.eq.s32.totalorder %v67_v3, %v392_v7  ;;  %vm94_vm4 = vcmp.eq.s32.totalorder %v68_v4, %v392_v7  ;;  %vm95_vm6 = vcmp.eq.s32.totalorder %v85_v5, %v392_v7  ;;  %p569_p12 = scmp.lt.s32.totalorder %s567_s8, %s563_s6 }
  0x3d   :  { %vm474_vm5 = vmpackc.low %vm92_vm2, %vm91_vm1  ;;  %vm96_vm7 = vcmp.eq.s32.totalorder %v86_v6, %v392_v7  ;;  %vm74_vm9 = vcmp.eq.s32.totalorder %v66_v2, %v387_v9  ;;  %vm75_vm11 = vcmp.eq.s32.totalorder %v67_v3, %v387_v9  ;;  %vm76_vm12 = vcmp.eq.s32.totalorder %v68_v4, %v387_v9 }
  0x3e   :  { %475 = vmatprep.subr.msk.bf16.mxu1 %vm474_vm5, %v596_v10  ;;  %vm478_vm10 = vmpackc.low %vm94_vm4, %vm93_vm3  ;;  %vm111_vm1 = vcmask 261120   ;;  %vm279_vm2 = vcmask 130048   ;;  %p570_p13 = por %p569_p12, %p568_p11 }
  0x3f   :  { %477 = vmatpush3.bf16.msk.msra.mxu1 %vm474_vm5, %v596_v10  ;;  %vm482_vm13 = vmpackc.low %vm96_vm7, %vm95_vm6  ;;  %441 = vmatprep.mubr.msk.f32.mxu0 %vm111_vm1, %v109_v12 }
  0x40   :  { %479 = vmatprep.subr.msk.bf16.mxu1 %vm478_vm10, %v596_v10  ;;  %vm466_vm14 = vmpackc.low %vm74_vm9, %vm73_vm8  ;;  %p571_p0 = pnand %p570_p13, %p564_p10 }
  0x41   :  { %467 = vmatprep.subr.msk.bf16.mxu0 %vm466_vm14, %v596_v10  ;;  %vm470_vm15 = vmpackc.low %vm76_vm12, %vm75_vm11 }
  0x42   :  { %469 = vmatpush3.bf16.msk.msra.mxu0 %vm466_vm14, %v596_v10 }
  0x43   :  { %481 = vmatpush3.bf16.msk.msra.mxu1 %vm478_vm10, %v596_v10  ;;  %471 = vmatprep.subr.msk.bf16.mxu0 %vm470_vm15, %v596_v10 }
  0x44   :  { %483 = vmatprep.subr.msk.bf16.mxu1 %vm482_vm13, %v596_v10 }
  0x46   :  { %473 = vmatpush3.bf16.msk.msra.mxu0 %vm470_vm15, %v596_v10 }
  0x47   :  { %485 = vmatpush3.bf16.msk.msra.mxu1 %vm482_vm13, %v596_v10 }
  0x49   :  { %442 = vmatmul.mubr.msk.f32.vlgmr.msra.gmra.mrb[0].mxu0 %vm111_vm1, %v110_v13 }
  0x4a   :  { %457 = vmatmul.mubr.msk.f32.vlgmr.msra.gmra.mrb[0].mxu1 %vm195_vm0, %v194_v11  ;;  %463 = vmatprep.mubr.msk.f32.mxu0 %vm279_vm2, %v277_v14 }
 0x11c   :  { %v443_v19 = vpop.f32.mrb[0].mxu0 }
 0x11d   :  { %v458_v15 = vpop.f32.mrb[0].mxu1  ;;  %v184_v20 = vpop.f32.mrb[1].mxu0 }
 0x11e   :  { %v268_v16 = vpop.f32.mrb[1].mxu1 }
 0x11f   :  { %v486_v17 = vpack.c.bf16 %v458_v15, %v268_v16 }
 0x121   :  { %487 = vmatprep.subr.bf16.mxu0 %v486_v17 }
 0x122   :  { %489 = vmatpush3.bf16.msra.mxu0 %v486_v17 }
 0x125   :  { %464 = vmatmul.mubr.msk.f32.vlgmr.msra.gmra.mrb[2].mxu0 %vm279_vm2, %v278_v18 }
 0x1f8   :  { %v465_v21 = vpop.f32.mrb[2].mxu0 }
 0x1f9   :  { %v362_v22 = vmul.f32 %v465_v21, %v443_v19  ;;  %v352_v23 = vpop.f32.mrb[3].mxu0 }
 0x1fa   :  { %v361_v24 = vmul.f32 %v352_v23, %v184_v20 }
 0x1fc   :  { %v363_v25 = vadd.f32 %v362_v22, %v361_v24 }
 0x1fe   :  { %v364_v26 = vrot.slane %v363_v25, 4 }
 0x200   :  { %v365_v27 = vadd.f32 %v364_v26, %v363_v25 }
 0x202   :  { %v366_v28 = vrot.slane %v365_v27, 2 }
 0x204   :  { %v367_v29 = vadd.f32 %v366_v28, %v365_v27 }
 0x206   :  { %v368_v30 = vrot.slane %v367_v29, 1 }
 0x208   :  { %v369_v31 = vadd.f32 %v368_v30, %v367_v29 }
 0x20a   :  { %370 = vst [vmem:[#allocation8] sm:$0x1] %v369_v31 }
 0x20b   :  { %574 = shalt.err (!%p571_p0)
}
 0x20c   :  { %s575_s11 = scalar_lea.hbm %s705_s5, 16 }
 0x20d   :  { %p576_p1 = scmp.ne.s32.totalorder %s705_s5, %s575_s11  ;;  %p579_p2 = scmp.lt.u32.totalorder %s575_s11, %s705_s5 }
 0x20f   :  { %p581_p3 = pnand %p579_p2, %p576_p1 }
 0x211   :  { %584 = shalt.err (!%p581_p3)
}
 0x212   :  { %380 = dma.vmem_to_hbm [thread:$0]  %s378_s4, 16, %s705_s5, [#allocation4]  }
 0x213   :  { %589 = dma.done.wait [#allocation4], 16  }
 0x214   :  { %590 = vsyncadd [#allocation4], 4294967280 }
 0x215   :  { %384 = vsyncpa [#allocation3], 1 }
 0x216   :  { %385 = vsyncpa [#allocation6], 1 }
 0x217   :  { %386 = vsyncpa [#allocation4], 1 }

</bundles_post_ra>
